<compile_context>
chip_gen: v7x
topology: tpu7x:2x2x1
jax: 0.10.0
libtpu: 0.0.40
codegen_flags: <defaults>
</compile_context>

<pallas_src>
import jax
import jax.numpy as jnp
from jax.experimental import pallas as pl
from jax.experimental.pallas import tpu as pltpu

EPS = 1e-8
LANE = 128
TILE_N_MAX = 1024  # rows per grid step; fits comfortably in v7x's 64 MiB VMEM


def _round_up(x, m):
    return (x + m - 1) // m * m


# ---------------------------------------------------------------------------
# Kernel: normalize/denormalize are pre-folded into the weights, so the body
# is just three MXU matmuls + two tanh passes + one lane-dense store.
# ---------------------------------------------------------------------------
def agent_model_kernel(
    obs_ref,     # (TILE_N, obs_dim)      f32
    enc_w_ref,   # (obs_dim, hidden)      bf16  (obs normalizer folded in)
    enc_b_ref,   # (1, hidden)            f32
    ac_w_ref,    # (hidden, hidden)       bf16
    ac_b_ref,    # (1, hidden)            f32
    head_w_ref,  # (hidden, HEAD_PAD)     bf16  (policy | denorm. value | zeros)
    head_b_ref,  # (1, HEAD_PAD)          f32
    out_ref,     # (TILE_N, HEAD_PAD)     f32
):
    x = obs_ref[...].astype(jnp.bfloat16)                       # bf16 MXU operand
    h = jnp.tanh(
        jnp.dot(x, enc_w_ref[...], preferred_element_type=jnp.float32)
        + enc_b_ref[...]
    )
    h = jnp.tanh(
        jnp.dot(h.astype(jnp.bfloat16), ac_w_ref[...],
                preferred_element_type=jnp.float32)
        + ac_b_ref[...]
    )
    out_ref[...] = (
        jnp.dot(h.astype(jnp.bfloat16), head_w_ref[...],
                preferred_element_type=jnp.float32)
        + head_b_ref[...]
    )


# ---------------------------------------------------------------------------
# One-time parameter preparation (cache the result; NOT per forward call).
# ---------------------------------------------------------------------------
def prepare_fused_params(params):
    """Fold normalizers into weights, fuse heads, pad to 128 lanes, cast bf16."""
    # obs normalizer: (x - mu) * r  folded into encoder layer
    r = jax.lax.rsqrt(params["obs_var"] + EPS)                  # (1, obs_dim)
    enc_w = params["enc_w"] * r.reshape(-1, 1)                  # (obs_dim, hidden)
    enc_b = params["enc_b"] - (params["obs_mean"] * r) @ params["enc_w"]

    # value denormalizer: v * s + m  folded into the value head
    s = jnp.sqrt(params["val_var"] + EPS)                       # (1, 1)
    v_w = params["v_w"] * s                                     # (hidden, 1)
    v_b = params["v_b"] * s + params["val_mean"]                # (1, 1)

    hidden, policy_dim = params["pi_w"].shape
    head_dim = policy_dim + 1
    head_pad = _round_up(head_dim, LANE)

    head_w = jnp.zeros((hidden, head_pad), jnp.float32)
    head_w = head_w.at[:, :policy_dim].set(params["pi_w"])
    head_w = head_w.at[:, policy_dim:head_dim].set(v_w)
    head_b = jnp.zeros((1, head_pad), jnp.float32)
    head_b = head_b.at[:, :policy_dim].set(params["pi_b"])
    head_b = head_b.at[:, policy_dim:head_dim].set(v_b)

    return {
        "enc_w": enc_w.astype(jnp.bfloat16),
        "enc_b": enc_b.astype(jnp.float32),
        "ac_w": params["ac_w"].astype(jnp.bfloat16),
        "ac_b": params["ac_b"].astype(jnp.float32),
        "head_w": head_w.astype(jnp.bfloat16),
        "head_b": head_b,
        "policy_dim": int(policy_dim),
    }


# ---------------------------------------------------------------------------
# Wrapper
# ---------------------------------------------------------------------------
def agent_model_forward(observation, fused, memory=None, *, tile_n_max=TILE_N_MAX):
    """observation: (T, B, obs_dim) f32.  Returns (policy, value, memory)."""
    T, B, obs_dim = observation.shape
    N = T * B
    hidden = fused["ac_w"].shape[0]
    policy_dim = fused["policy_dim"]
    head_pad = fused["head_w"].shape[1]

    obs2d = observation.reshape(N, obs_dim).astype(jnp.float32)

    # Row tile: multiple of 16, capped; pad N so the grid has no ragged tail.
    tile_n = min(tile_n_max, _round_up(N, 16))
    n_pad = _round_up(N, tile_n)
    if n_pad != N:
        obs2d = jnp.pad(obs2d, ((0, n_pad - N), (0, 0)))
    grid = (n_pad // tile_n,)

    weight_bytes = 2 * (obs_dim * hidden + hidden * hidden + hidden * head_pad)
    cost = pl.CostEstimate(
        flops=2 * n_pad * (obs_dim * hidden + hidden * hidden + hidden * head_pad),
        transcendentals=2 * n_pad * hidden,
        bytes_accessed=n_pad * obs_dim * 4 + n_pad * head_pad * 4 + weight_bytes,
    )

    out = pl.pallas_call(
        agent_model_kernel,
        out_shape=jax.ShapeDtypeStruct((n_pad, head_pad), jnp.float32),
        grid=grid,
        in_specs=[
            pl.BlockSpec((tile_n, obs_dim), lambda i: (i, 0)),   # streamed rows
            pl.BlockSpec((obs_dim, hidden), lambda i: (0, 0)),   # resident weights
            pl.BlockSpec((1, hidden), lambda i: (0, 0)),
            pl.BlockSpec((hidden, hidden), lambda i: (0, 0)),
            pl.BlockSpec((1, hidden), lambda i: (0, 0)),
            pl.BlockSpec((hidden, head_pad), lambda i: (0, 0)),
            pl.BlockSpec((1, head_pad), lambda i: (0, 0)),
        ],
        out_specs=pl.BlockSpec((tile_n, head_pad), lambda i: (i, 0)),
        compiler_params=pltpu.CompilerParams(
            dimension_semantics=("parallel",),          # 2-TC sharding on v7x
            vmem_limit_bytes=32 * 1024 * 1024,          # safe on v5e/v6e/v7x
        ),
        cost_estimate=cost,
    )(
        obs2d,
        fused["enc_w"], fused["enc_b"],
        fused["ac_w"], fused["ac_b"],
        fused["head_w"], fused["head_b"],
    )

    policy = out[:N, :policy_dim].reshape(T, B, policy_dim)
    value = out[:N, policy_dim:policy_dim + 1].reshape(T, B, 1)
    # non-recurrent encoder: memory is passed through unchanged
    return policy, value, memory


# ---------------------------------------------------------------------------
# Synthetic params + plain-JAX reference (original, un-fused math)
# ---------------------------------------------------------------------------
def make_params(key, obs_dim, hidden, action_dim):
    ks = jax.random.split(key, 8)
    policy_dim = 2 * action_dim  # mean + log_std
    scale = 0.1
    return {
        "obs_mean": jax.random.normal(ks[0], (1, obs_dim), jnp.float32) * 0.5,
        "obs_var": jnp.abs(jax.random.normal(ks[1], (1, obs_dim), jnp.float32)) + 1.0,
        "enc_w": jax.random.normal(ks[2], (obs_dim, hidden), jnp.float32) * scale,
        "enc_b": jnp.zeros((1, hidden), jnp.float32),
        "ac_w": jax.random.normal(ks[3], (hidden, hidden), jnp.float32) * scale,
        "ac_b": jnp.zeros((1, hidden), jnp.float32),
        "pi_w": jax.random.normal(ks[4], (hidden, policy_dim), jnp.float32) * scale,
        "pi_b": jnp.zeros((1, policy_dim), jnp.float32),
        "v_w": jax.random.normal(ks[5], (hidden, 1), jnp.float32) * scale,
        "v_b": jnp.zeros((1, 1), jnp.float32),
        "val_mean": jax.random.normal(ks[6], (1, 1), jnp.float32),
        "val_var": jnp.abs(jax.random.normal(ks[7], (1, 1), jnp.float32)) + 1.0,
    }


def reference_forward(observation, params):
    T, B, obs_dim = observation.shape
    x = observation.reshape(T * B, obs_dim)
    x = (x - params["obs_mean"]) * jax.lax.rsqrt(params["obs_var"] + EPS)
    h = jnp.tanh(x @ params["enc_w"] + params["enc_b"])
    h = jnp.tanh(h @ params["ac_w"] + params["ac_b"])
    policy = h @ params["pi_w"] + params["pi_b"]
    value = h @ params["v_w"] + params["v_b"]
    value = value * jnp.sqrt(params["val_var"] + EPS) + params["val_mean"]
    return policy.reshape(T, B, -1), value.reshape(T, B, 1)


if __name__ == "__main__":
    obs_dim, hidden, action_dim = 16, 32, 4
    key = jax.random.PRNGKey(0)
    k_obs, k_par, k_obs2 = jax.random.split(key, 3)
    params = make_params(k_par, obs_dim, hidden, action_dim)
    fused = prepare_fused_params(params)          # one-time, cached

    # --- small shape (single tile) ---
    T, B = 8, 2
    observation = jax.random.normal(k_obs, (T, B, obs_dim), jnp.float32)
    policy, value, memory = agent_model_forward(observation, fused)
    policy = jax.block_until_ready(policy)
    value = jax.block_until_ready(value)
    ref_policy, ref_value = reference_forward(observation, params)
    assert policy.shape == (T, B, 2 * action_dim)
    assert value.shape == (T, B, 1)
    # bf16 MXU operands -> loosened tolerance vs. the f32 reference
    assert jnp.allclose(policy, ref_policy, atol=2e-2, rtol=2e-2)
    assert jnp.allclose(value, ref_value, atol=2e-2, rtol=2e-2)

    # --- multi-tile shape with a ragged tail (exercises grid + padding) ---
    T2, B2 = 33, 16                                # N = 528, tile_n = 128 -> 5 tiles
    observation2 = jax.random.normal(k_obs2, (T2, B2, obs_dim), jnp.float32)
    policy2, value2, _ = agent_model_forward(observation2, fused, tile_n_max=128)
    policy2 = jax.block_until_ready(policy2)
    value2 = jax.block_until_ready(value2)
    ref_policy2, ref_value2 = reference_forward(observation2, params)
    assert jnp.allclose(policy2, ref_policy2, atol=2e-2, rtol=2e-2)
    assert jnp.allclose(value2, ref_value2, atol=2e-2, rtol=2e-2)

    # TODO(synk): pi_distribution.sample (action sampling / log_prob), the
    # recurrent-encoder path, and the reward normalizer/scaler are policy-
    # config dependent and not part of the forward tensor hot path; they are
    # intentionally not implemented in the kernel.
    print("KERNEL_OK")
</pallas_src>

<mosaic_0001>
module attributes {stable_mosaic.version = 11 : i64} {
  func.func @agent_model_kernel(%arg0: i32, %arg1: memref<16x16xf32, #tpu.memory_space<vmem>>, %arg2: memref<16x32xbf16, #tpu.memory_space<vmem>>, %arg3: memref<1x32xf32, #tpu.memory_space<vmem>>, %arg4: memref<32x32xbf16, #tpu.memory_space<vmem>>, %arg5: memref<1x32xf32, #tpu.memory_space<vmem>>, %arg6: memref<32x128xbf16, #tpu.memory_space<vmem>>, %arg7: memref<1x128xf32, #tpu.memory_space<vmem>>, %arg8: memref<16x128xf32, #tpu.memory_space<vmem>>) attributes {dimension_semantics = [#tpu.dimension_semantics<parallel>], iteration_bounds = array<i64: 1>, scalar_prefetch = 0 : i64, scratch_operands = 0 : i64, tpu.core_type = #tpu.core_type<tc>, window_params = [{transform_indices = @transform_0, window_bounds = array<i64: 16, 16>}, {pipeline_mode = #tpu.pipeline_mode<synchronous>, transform_indices = @transform_1, window_bounds = array<i64: 16, 32>}, {pipeline_mode = #tpu.pipeline_mode<synchronous>, transform_indices = @transform_2, window_bounds = array<i64: 1, 32>}, {pipeline_mode = #tpu.pipeline_mode<synchronous>, transform_indices = @transform_3, window_bounds = array<i64: 32, 32>}, {pipeline_mode = #tpu.pipeline_mode<synchronous>, transform_indices = @transform_4, window_bounds = array<i64: 1, 32>}, {pipeline_mode = #tpu.pipeline_mode<synchronous>, transform_indices = @transform_5, window_bounds = array<i64: 32, 128>}, {pipeline_mode = #tpu.pipeline_mode<synchronous>, transform_indices = @transform_6, window_bounds = array<i64: 1, 128>}, {transform_indices = @transform_7, window_bounds = array<i64: 16, 128>}]} {
    %c0 = arith.constant 0 : index
    %c0_0 = arith.constant 0 : index
    %0 = vector.load %arg1[%c0, %c0_0] : memref<16x16xf32, #tpu.memory_space<vmem>>, vector<16x16xf32>
    %1 = arith.truncf %0 : vector<16x16xf32> to vector<16x16xbf16>
    %c0_1 = arith.constant 0 : index
    %c0_2 = arith.constant 0 : index
    %2 = vector.load %arg2[%c0_1, %c0_2] : memref<16x32xbf16, #tpu.memory_space<vmem>>, vector<16x32xbf16>
    %cst = arith.constant dense<0.000000e+00> : vector<16x32xf32>
    %3 = tpu.matmul %1, %2, %cst {dimension_numbers = #tpu.dot_dimension_numbers<[1], [0], [0], [1], [0, 0, 1, 1], [], []>} : vector<16x16xbf16>, vector<16x32xbf16>, vector<16x32xf32> -> vector<16x32xf32>
    %c0_3 = arith.constant 0 : index
    %c0_4 = arith.constant 0 : index
    %4 = vector.load %arg3[%c0_3, %c0_4] : memref<1x32xf32, #tpu.memory_space<vmem>>, vector<1x32xf32>
    %5 = vector.broadcast %4 : vector<1x32xf32> to vector<16x32xf32>
    %6 = arith.addf %3, %5 : vector<16x32xf32>
    %7 = math.tanh %6 : vector<16x32xf32>
    %8 = arith.truncf %7 : vector<16x32xf32> to vector<16x32xbf16>
    %c0_5 = arith.constant 0 : index
    %c0_6 = arith.constant 0 : index
    %9 = vector.load %arg4[%c0_5, %c0_6] : memref<32x32xbf16, #tpu.memory_space<vmem>>, vector<32x32xbf16>
    %cst_7 = arith.constant dense<0.000000e+00> : vector<16x32xf32>
    %10 = tpu.matmul %8, %9, %cst_7 {dimension_numbers = #tpu.dot_dimension_numbers<[1], [0], [0], [1], [0, 0, 1, 1], [], []>} : vector<16x32xbf16>, vector<32x32xbf16>, vector<16x32xf32> -> vector<16x32xf32>
    %c0_8 = arith.constant 0 : index
    %c0_9 = arith.constant 0 : index
    %11 = vector.load %arg5[%c0_8, %c0_9] : memref<1x32xf32, #tpu.memory_space<vmem>>, vector<1x32xf32>
    %12 = vector.broadcast %11 : vector<1x32xf32> to vector<16x32xf32>
    %13 = arith.addf %10, %12 : vector<16x32xf32>
    %14 = math.tanh %13 : vector<16x32xf32>
    %15 = arith.truncf %14 : vector<16x32xf32> to vector<16x32xbf16>
    %c0_10 = arith.constant 0 : index
    %c0_11 = arith.constant 0 : index
    %16 = vector.load %arg6[%c0_10, %c0_11] : memref<32x128xbf16, #tpu.memory_space<vmem>>, vector<32x128xbf16>
    %cst_12 = arith.constant dense<0.000000e+00> : vector<16x128xf32>
    %17 = tpu.matmul %15, %16, %cst_12 {dimension_numbers = #tpu.dot_dimension_numbers<[1], [0], [0], [1], [0, 0, 1, 1], [], []>} : vector<16x32xbf16>, vector<32x128xbf16>, vector<16x128xf32> -> vector<16x128xf32>
    %c0_13 = arith.constant 0 : index
    %c0_14 = arith.constant 0 : index
    %18 = vector.load %arg7[%c0_13, %c0_14] : memref<1x128xf32, #tpu.memory_space<vmem>>, vector<1x128xf32>
    %19 = vector.broadcast %18 : vector<1x128xf32> to vector<16x128xf32>
    %20 = arith.addf %17, %19 : vector<16x128xf32>
    %c0_15 = arith.constant 0 : index
    %c0_16 = arith.constant 0 : index
    %21 = vector.load %arg8[%c0_15, %c0_16] : memref<16x128xf32, #tpu.memory_space<vmem>>, vector<16x128xf32>
    tpu.vector_store %arg8[%c0_15, %c0_16], %20 {strides = array<i32>} : memref<16x128xf32, #tpu.memory_space<vmem>>, vector<16x128xf32>,
    return
  }
  func.func @transform_0(%arg0: i32) -> (i32, i32) {
    %c0_i32 = arith.constant 0 : i32
    %c0_i32_0 = arith.constant 0 : i32
    return %arg0, %c0_i32 : i32, i32
  }
  func.func @transform_1(%arg0: i32) -> (i32, i32) {
    %c0_i32 = arith.constant 0 : i32
    %c0_i32_0 = arith.constant 0 : i32
    %c0_i32_1 = arith.constant 0 : i32
    return %c0_i32, %c0_i32_0 : i32, i32
  }
  func.func @transform_2(%arg0: i32) -> (i32, i32) {
    %c0_i32 = arith.constant 0 : i32
    %c0_i32_0 = arith.constant 0 : i32
    %c0_i32_1 = arith.constant 0 : i32
    return %c0_i32, %c0_i32_0 : i32, i32
  }
  func.func @transform_3(%arg0: i32) -> (i32, i32) {
    %c0_i32 = arith.constant 0 : i32
    %c0_i32_0 = arith.constant 0 : i32
    %c0_i32_1 = arith.constant 0 : i32
    return %c0_i32, %c0_i32_0 : i32, i32
  }
  func.func @transform_4(%arg0: i32) -> (i32, i32) {
    %c0_i32 = arith.constant 0 : i32
    %c0_i32_0 = arith.constant 0 : i32
    %c0_i32_1 = arith.constant 0 : i32
    return %c0_i32, %c0_i32_0 : i32, i32
  }
  func.func @transform_5(%arg0: i32) -> (i32, i32) {
    %c0_i32 = arith.constant 0 : i32
    %c0_i32_0 = arith.constant 0 : i32
    %c0_i32_1 = arith.constant 0 : i32
    return %c0_i32, %c0_i32_0 : i32, i32
  }
  func.func @transform_6(%arg0: i32) -> (i32, i32) {
    %c0_i32 = arith.constant 0 : i32
    %c0_i32_0 = arith.constant 0 : i32
    %c0_i32_1 = arith.constant 0 : i32
    return %c0_i32, %c0_i32_0 : i32, i32
  }
  func.func @transform_7(%arg0: i32) -> (i32, i32) {
    %c0_i32 = arith.constant 0 : i32
    %c0_i32_0 = arith.constant 0 : i32
    return %arg0, %c0_i32 : i32, i32
  }
}

</mosaic_0001>

<bundles_post_ra>
// kernel: tpu_custom_call.1
= control target key start
LH: loop header
LB: loop body
LE: loop exit
PB: predicated region body
PF: predicated region fallthrough
CT: control target
= control target key end

     0   :  { %12 = vsyncpa [#allocation3], 0  ;;  %s578_s0 = inlined_call_operand.hbm [shape: f32[16,16], index: 0, kind: input, shape index: {}]   ;;  %s579_s1 = inlined_call_operand.hbm [shape: bf16[16,32], index: 1, kind: input, shape index: {}]   ;;  %s580_s2 = inlined_call_operand.vmem [shape: f32[1,32], index: 2, kind: input, shape index: {}]   ;;  %s581_s3 = inlined_call_operand.hbm [shape: bf16[32,32], index: 3, kind: input, shape index: {}]   ;;  %s582_s4 = inlined_call_operand.vmem [shape: f32[1,32], index: 4, kind: input, shape index: {}]   ;;  %s583_s5 = inlined_call_operand.vmem [shape: bf16[32,128], index: 5, kind: input, shape index: {}]   ;;  %s584_s6 = inlined_call_operand.vmem [shape: f32[1,128], index: 6, kind: input, shape index: {}]   ;;  %s585_s7 = inlined_call_operand.hbm [shape: f32[16,128], index: 7, kind: output, shape index: {}]  }
   0x1   :  { %13 = vsyncpa [#allocation6], 0 }
   0x2   :  { %14 = vsyncpa [#allocation4], 0  ;;  %s451_s24 = smov [#allocation5]   ;;  %s357_s28 = scalar_lea.hbm %s579_s1, 128 }
   0x3   :  { %s32_s25 = sshll.u32 %s451_s24, 4  ;;  %p358_p0 = scmp.ne.s32.totalorder %s579_s1, %s357_s28  ;;  %s33_s25 = int_to_ptr.vmem [resolvable:$true] %s32_s25 }
   0x4   :  { %p361_p1 = scmp.lt.u32.totalorder %s357_s28, %s579_s1 }
   0x6   :  { %p363_p2 = pnand %p361_p1, %p358_p0 }
   0x8   :  { %366 = shalt.err (!%p363_p2)
}
   0x9   :  { %s367_s10 = scalar_lea.vmem %s33_s25, 128  ;;  %p372_p4 = scmp.lt.s32.totalorder %s33_s25, %s33_s25 }
   0xa   :  { %p368_p3 = scmp.ne.s32.totalorder %s33_s25, %s367_s10  ;;  %p373_p5 = scmp.lt.s32.totalorder %s367_s10, %s367_s10 }
   0xc   :  { %p374_p6 = por %p373_p5, %p372_p4 }
   0xe   :  { %p375_p7 = pnand %p374_p6, %p368_p3 }
  0x10   :  { %378 = shalt.err (!%p375_p7)
}
  0x11   :  { %s452_s11 = smov 64   ;;  %s453_s12 = smov 4  }
  0x12   :  { %38 = dma.hbm_to_vmem [thread:$0]  %s579_s1, 128, %s33_s25, [#allocation6], %s452_s11, %s452_s11, %s453_s12  }
  0x13   :  { %s454_s15 = smov [#allocation2]   ;;  %s379_s19 = scalar_lea.hbm %s578_s0, 256 }
  0x14   :  { %s20_s16 = sshll.u32 %s454_s15, 4  ;;  %p380_p8 = scmp.ne.s32.totalorder %s578_s0, %s379_s19  ;;  %s21_s16 = int_to_ptr.vmem [resolvable:$true] %s20_s16 }
  0x15   :  { %p383_p9 = scmp.lt.u32.totalorder %s379_s19, %s578_s0 }
  0x17   :  { %p385_p10 = pnand %p383_p9, %p380_p8 }
  0x19   :  { %388 = shalt.err (!%p385_p10)
}
  0x1a   :  { %s389_s24 = scalar_lea.vmem %s21_s16, 256  ;;  %p394_p12 = scmp.lt.s32.totalorder %s21_s16, %s21_s16 }
  0x1b   :  { %p390_p11 = scmp.ne.s32.totalorder %s21_s16, %s389_s24  ;;  %p395_p13 = scmp.lt.s32.totalorder %s389_s24, %s389_s24 }
  0x1d   :  { %p396_p0 = por %p395_p13, %p394_p12 }
  0x1f   :  { %p397_p1 = pnand %p396_p0, %p390_p11 }
  0x21   :  { %400 = shalt.err (!%p397_p1)
}
  0x22   :  { %s455_s1 = smov 128   ;;  %s456_s25 = smov 8  }
  0x23   :  { %26 = dma.hbm_to_vmem [thread:$0]  %s578_s0, 256, %s21_s16, [#allocation3], %s455_s1, %s455_s1, %s456_s25  }
  0x24   :  { %s457_s28 = smov [#allocation7]   ;;  %s401_s9 = scalar_lea.hbm %s581_s3, 256 }
  0x25   :  { %s46_s29 = sshll.u32 %s457_s28, 4  ;;  %p402_p2 = scmp.ne.s32.totalorder %s581_s3, %s401_s9  ;;  %s47_s29 = int_to_ptr.vmem [resolvable:$true] %s46_s29 }
  0x26   :  { %p405_p3 = scmp.lt.u32.totalorder %s401_s9, %s581_s3 }
  0x28   :  { %p407_p4 = pnand %p405_p3, %p402_p2 }
  0x2a   :  { %410 = shalt.err (!%p407_p4)
}
  0x2b   :  { %s411_s17 = scalar_lea.vmem %s47_s29, 256  ;;  %p416_p6 = scmp.lt.s32.totalorder %s47_s29, %s47_s29 }
  0x2c   :  { %p412_p5 = scmp.ne.s32.totalorder %s47_s29, %s411_s17  ;;  %p417_p7 = scmp.lt.s32.totalorder %s411_s17, %s411_s17 }
  0x2e   :  { %p418_p8 = por %p417_p7, %p416_p6 }
  0x30   :  { %p419_p9 = pnand %p418_p8, %p412_p5 }
  0x32   :  { %422 = shalt.err (!%p419_p9)
}
  0x33   :  { %52 = dma.hbm_to_vmem [thread:$0]  %s581_s3, 256, %s47_s29, [#allocation6], %s452_s11, %s452_s11, %s453_s12  }
  0x34   :  { %445 = dma.done.wait [#allocation3], 256  }
  0x35   :  { %446 = vsyncadd [#allocation3], 4294967040 }
  0x36   :  { %447 = dma.done.wait [#allocation6], 384  }
  0x37   :  { %448 = vsyncadd [#allocation6], 4294966912  ;;  %v458_v0 = vmov 0.0   ;;  %vm459_vm0 = vmmov 0   ;;  %v344_v1 = vld [vmem:[#allocation5] sm:$0xff]   ;;  %v69_v2 = vld [vmem:[#allocation2] sm:$0xff] }
  0x38   :  { %312 = vmatprep.subr.bf16.mxu0 %v458_v0  ;;  %314 = vmatprep.mubr.msk.bf16.mxu0 %vm459_vm0, %v458_v0  ;;  %v70_v3 = vld [vmem:[#allocation2 + $0x8] sm:$0xff]  ;;  %vm87_vm1 = vcmask 130048   ;;  %v345_v5 = vld [vmem:[#allocation7] sm:$0xff]   ;;  %v346_v6 = vld [vmem:[#allocation7 + $0x8] sm:$0xff]   ;;  %vm158_vm2 = vcmask 261120   ;;  %s460_s23 = smov [#allocation8]  }
  0x39   :  { %318 = vmatprep.subr.bf16.mxu1 %v458_v0  ;;  %322 = vmatprep.mubr.msk.bf16.mxu1 %vm459_vm0, %v458_v0  ;;  %v71_v4 = vpack.c.bf16 %v70_v3, %v69_v2  ;;  %v293_v7 = vld [vmem:[%s580_s2] ss:$0 sm:$0xff]  ;;  %v348_v18 = vld [vmem:[%s583_s5 + $0x8] sm:$0xff]  }
  0x3a   :  { %313 = vmatpush3.bf16.msra.mxu0 %v344_v1  ;;  %319 = vmatpush3.bf16.msra.mxu1 %v345_v5  ;;  %v347_v17 = vld [vmem:[%s583_s5] sm:$0xff]  }
  0x3b   :  { %326 = vmatprep.subr.bf16.mxu0 %v458_v0  ;;  %320 = vmatprep.subr.bf16.mxu1 %v458_v0  ;;  %v296_v19 = vld [vmem:[%s582_s4] ss:$0 sm:$0xff]  ;;  %s280_s4 = sshll.u32 %s460_s23, 4  ;;  %s281_s4 = int_to_ptr.vmem [resolvable:$true] %s280_s4 }
  0x3c   :  { %v300_v29 = vld [vmem:[%s584_s6] ss:$0 sm:$0xff]  ;;  %s423_s24 = scalar_lea.vmem %s281_s4, 256  ;;  %p428_p11 = scmp.lt.s32.totalorder %s281_s4, %s281_s4 }
  0x3d   :  { %315 = vmatmul.mubr.msk.bf16.vlgmr.msra.gmra.mrb[0].mxu0 %vm87_vm1, %v71_v4  ;;  %p424_p10 = scmp.ne.s32.totalorder %s281_s4, %s423_s24  ;;  %p429_p12 = scmp.lt.s32.totalorder %s423_s24, %s423_s24 }
  0x3e   :  { %330 = vmatprep.mubr.msk.bf16.mxu0 %vm459_vm0, %v458_v0  ;;  %321 = vmatpush3.bf16.msra.mxu1 %v346_v6 }
  0x3f   :  { %327 = vmatpush3.bf16.msra.mxu0 %v347_v17  ;;  %p430_p13 = por %p429_p12, %p428_p11 }
  0x40   :  { %328 = vmatprep.subr.bf16.mxu0 %v458_v0 }
  0x41   :  { %p431_p0 = pnand %p430_p13, %p424_p10 }
  0x43   :  { %329 = vmatpush3.bf16.msra.mxu0 %v348_v18 }
 0x110   :  { %v125_v8 = vpop.f32.mrb[0].mxu0 }
 0x111   :  { %v126_v9 = vadd.f32 %v293_v7, %v125_v8  ;;  %v316_v10 = vpop.f32.mrb[1].mxu0 }
 0x112   :  { %v128_v11 = vpop.f32.mrb[2].mxu0 }
 0x113   :  { %v129_v12 = vadd.f32 %v293_v7, %v128_v11  ;;  %v317_v13 = vpop.f32.mrb[3].mxu0  ;;  %349 = vtanh.f32 %v126_v9 }
 0x115   :  { %351 = vtanh.f32 %v129_v12 }
 0x11d   :  { %v350_v14 = vpop.eup %349 }
 0x11f   :  { %v352_v15 = vpop.eup %351 }
 0x120   :  { %v134_v16 = vpack.c.bf16 %v352_v15, %v350_v14 }
 0x122   :  { %323 = vmatmul.mubr.msk.bf16.vlgmr.msra.gmra.mrb[0].mxu1 %vm158_vm2, %v134_v16 }
 0x1f5   :  { %v196_v20 = vpop.f32.mrb[0].mxu1 }
 0x1f6   :  { %v197_v21 = vadd.f32 %v296_v19, %v196_v20  ;;  %v324_v22 = vpop.f32.mrb[1].mxu1 }
 0x1f7   :  { %v199_v23 = vpop.f32.mrb[2].mxu1 }
 0x1f8   :  { %v200_v24 = vadd.f32 %v296_v19, %v199_v23  ;;  %v325_v25 = vpop.f32.mrb[3].mxu1  ;;  %353 = vtanh.f32 %v197_v21 }
 0x1fa   :  { %355 = vtanh.f32 %v200_v24 }
 0x202   :  { %v354_v26 = vpop.eup %353 }
 0x204   :  { %v356_v27 = vpop.eup %355 }
 0x205   :  { %v205_v28 = vpack.c.bf16 %v356_v27, %v354_v26 }
 0x207   :  { %331 = vmatmul.mubr.msk.bf16.vlgmr.msra.gmra.mrb[4].mxu0 %vm158_vm2, %v205_v28 }
 0x2da   :  { %v266_v30 = vpop.f32.mrb[4].mxu0 }
 0x2db   :  { %v267_v31 = vadd.f32 %v300_v29, %v266_v30  ;;  %v332_v32 = vpop.f32.mrb[5].mxu0 }
 0x2dc   :  { %v269_v33 = vpop.f32.mrb[6].mxu0 }
 0x2dd   :  { %273 = vst [vmem:[#allocation8] sm:$0xff] %v267_v31  ;;  %v270_v34 = vadd.f32 %v300_v29, %v269_v33  ;;  %v333_v35 = vpop.f32.mrb[7].mxu0 }
 0x2df   :  { %274 = vst [vmem:[#allocation8 + $0x8] sm:$0xff] %v270_v34 }
 0x2e0   :  { %434 = shalt.err (!%p431_p0)
}
 0x2e1   :  { %s435_s27 = scalar_lea.hbm %s585_s7, 256 }
 0x2e2   :  { %p436_p1 = scmp.ne.s32.totalorder %s585_s7, %s435_s27  ;;  %p439_p2 = scmp.lt.u32.totalorder %s435_s27, %s585_s7 }
 0x2e4   :  { %p441_p3 = pnand %p439_p2, %p436_p1 }
 0x2e6   :  { %444 = shalt.err (!%p441_p3)
}
 0x2e7   :  { %286 = dma.vmem_to_hbm [thread:$0]  %s281_s4, 256, %s585_s7, [#allocation4], %s455_s1, %s455_s1, %s456_s25  }
 0x2e8   :  { %449 = dma.done.wait [#allocation4], 256  }
 0x2e9   :  { %450 = vsyncadd [#allocation4], 4294967040 }
 0x2ea   :  { %290 = vsyncpa [#allocation3], 1 }
 0x2eb   :  { %291 = vsyncpa [#allocation6], 1 }
 0x2ec   :  { %292 = vsyncpa [#allocation4], 1 }

</bundles_post_ra>
